<compile_context>
chip_gen: v5e
topology: v5e:2x2
jax: 0.10.0
libtpu: 0.0.40
codegen_flags: <defaults>
</compile_context>

<pallas_src>
import functools

import jax
import jax.numpy as jnp
from jax.experimental import pallas as pl
from jax.experimental.pallas import tpu as pltpu

_LANE = 128


def _round_up(x, m):
    return ((x + m - 1) // m) * m


def _mlp_kernel(n_linear, out_dims_p, use_bf16, x_ref, bias_ref, *rest):
    """Fused MLP forward.

    rest = (w1, ..., wN, out_ref).  All feature dims are pre-padded to
    multiples of 128 in the wrapper, so every matmul and the final store are
    lane-dense.  Layer loop is a static Python unroll (n_linear is small).
    """
    w_refs = rest[:n_linear]
    o_ref = rest[-1]

    biases = bias_ref[...]                    # (n_linear, max_out_p), f32
    h = x_ref[...].astype(jnp.float32)        # (batch_tile, in_feat_p)
    for li in range(n_linear):
        w = w_refs[li][...]
        if use_bf16:
            lhs = h.astype(jnp.bfloat16)      # feed MXU bf16, accumulate f32
            rhs = w.astype(jnp.bfloat16)
        else:
            lhs = h
            rhs = w.astype(jnp.float32)
        acc = jnp.dot(lhs, rhs, preferred_element_type=jnp.float32)
        # Bias add + ReLU stay in f32 on the VPU.
        h = acc + biases[li, : out_dims_p[li]][None, :]
        if li < n_linear - 1:                 # ReLU on hidden layers only
            h = jnp.maximum(h, 0.0)
    o_ref[...] = h.astype(o_ref.dtype)


def flexible_mlp_forward(x_nchw, weights, biases, *, batch_tile=128,
                         use_bf16_matmul=False):
    """Run the FlexibleMLP forward pass with a single fused Pallas kernel.

    x_nchw : (B, C, H, W)  -- flattened to (B, C*H*W) features.
    weights: list of (in_i, out_i) arrays (already transposed from PyTorch).
    biases : list of (out_i,) arrays.
    """
    B = x_nchw.shape[0]
    x = x_nchw.reshape(B, -1).astype(jnp.float32)   # Flatten (plain-JAX glue)
    in_feat = x.shape[1]
    n_linear = len(weights)
    out_feat = weights[-1].shape[1]

    # ---- pad all dims to TPU-friendly sizes (zero padding => exact math) ----
    in_feat_p = _round_up(in_feat, _LANE)
    out_dims = [w.shape[1] for w in weights]
    out_dims_p = [_round_up(d, _LANE) for d in out_dims]
    in_dims_p = [in_feat_p] + out_dims_p[:-1]

    B_p = _round_up(B, batch_tile)
    x_p = jnp.zeros((B_p, in_feat_p), jnp.float32).at[:B, :in_feat].set(x)

    weights_p = []
    for w, ip, op in zip(weights, in_dims_p, out_dims_p):
        wp = (jnp.zeros((ip, op), jnp.float32)
              .at[: w.shape[0], : w.shape[1]].set(w.astype(jnp.float32)))
        weights_p.append(wp)

    max_out_p = max(out_dims_p)
    bias_pack = jnp.zeros((n_linear, max_out_p), jnp.float32)
    for li, b in enumerate(biases):
        bias_pack = bias_pack.at[li, : b.shape[0]].set(b.astype(jnp.float32))

    grid = (B_p // batch_tile,)

    # NOTE: weights/biases are grid-invariant (index_map is constant), so only
    # the batch-tiled x / out blocks change per step.
    # TODO(synk): use pl.Buffered(1) on the weight specs once single-buffered
    # pipeline_mode is reliably supported, to halve resident-weight VMEM.
    in_specs = [
        pl.BlockSpec((batch_tile, in_feat_p), lambda i: (i, 0)),   # x tile
        pl.BlockSpec(bias_pack.shape, lambda i: (0, 0)),           # packed biases
    ]
    args = [x_p, bias_pack]
    for wp in weights_p:
        in_specs.append(pl.BlockSpec(wp.shape, lambda i: (0, 0)))
        args.append(wp)

    out_last_p = out_dims_p[-1]
    out_spec = pl.BlockSpec((batch_tile, out_last_p), lambda i: (i, 0))

    # VMEM budget: default double-buffering for each block + headroom.
    vmem_bytes = 2 * batch_tile * in_feat_p * 4        # x
    vmem_bytes += 2 * batch_tile * out_last_p * 4      # out
    vmem_bytes += 2 * n_linear * max_out_p * 4         # packed biases
    for wp in weights_p:
        vmem_bytes += 2 * wp.size * 4                  # weights
    vmem_limit = min(max(vmem_bytes + (4 << 20), 32 << 20), 64 << 20)

    kernel = functools.partial(_mlp_kernel, n_linear, tuple(out_dims_p),
                               use_bf16_matmul)

    out_p = pl.pallas_call(
        kernel,
        grid=grid,
        in_specs=in_specs,
        out_specs=out_spec,
        out_shape=jax.ShapeDtypeStruct((B_p, out_last_p), jnp.float32),
        compiler_params=pltpu.CompilerParams(
            dimension_semantics=("parallel",),
            vmem_limit_bytes=vmem_limit,
        ),
    )(*args)

    # Strip batch padding and the lane padding on the final layer.
    return out_p[:B, :out_feat]


def init_flexible_mlp_params(key, n_pixel_1d, layer_size, n_layers):
    """Deterministic parameter init mirroring the PyTorch module's shapes.

    Returns weights as (in, out) [transposed from PyTorch's (out, in)] and
    biases as (out,), in forward order:
      Linear(n_pixel_1d**2 -> layer_size), (n_layers-1)x Linear(layer_size ->
      layer_size), Linear(layer_size -> 10).
    """
    dims = [n_pixel_1d ** 2] + [layer_size] * n_layers + [10]
    weights, biases = [], []
    for i in range(len(dims) - 1):
        key, kw, kb = jax.random.split(key, 3)
        fan_in, fan_out = dims[i], dims[i + 1]
        bound = 1.0 / jnp.sqrt(fan_in)
        w = jax.random.uniform(kw, (fan_in, fan_out), jnp.float32, -bound, bound)
        b = jax.random.uniform(kb, (fan_out,), jnp.float32, -bound, bound)
        weights.append(w)
        biases.append(b)
    return weights, biases


def reference_mlp(x_nchw, weights, biases):
    """Pure-JAX reference mirroring torch semantics."""
    h = x_nchw.reshape(x_nchw.shape[0], -1)
    n = len(weights)
    for i, (w, b) in enumerate(zip(weights, biases)):
        h = h @ w + b
        if i < n - 1:
            h = jnp.maximum(h, 0.0)
    return h


if __name__ == "__main__":
    # Small shapes consistent with the module: 16x16 single-channel images,
    # layer_size=128, n_layers=3, batch=8.
    n_pixel_1d = 16
    layer_size = 128
    n_layers = 3
    batch = 8

    key = jax.random.PRNGKey(0)
    key, kx = jax.random.split(key)
    x = jax.random.normal(kx, (batch, 1, n_pixel_1d, n_pixel_1d), jnp.float32)

    weights, biases = init_flexible_mlp_params(key, n_pixel_1d, layer_size, n_layers)

    ref = reference_mlp(x, weights, biases)

    # f32-fed MXU path: tight tolerance vs. the reference.
    out = flexible_mlp_forward(x, weights, biases)
    out = jax.block_until_ready(out)
    assert out.shape == (batch, 10), out.shape
    assert jnp.allclose(out, ref, atol=1e-4, rtol=1e-4), (
        float(jnp.max(jnp.abs(out - ref)))
    )

    # bf16-fed MXU path (f32 accumulation): looser tolerance.
    out_bf16 = flexible_mlp_forward(x, weights, biases, use_bf16_matmul=True)
    out_bf16 = jax.block_until_ready(out_bf16)
    assert out_bf16.shape == (batch, 10), out_bf16.shape
    assert jnp.allclose(out_bf16, ref, atol=2e-1, rtol=1e-1), (
        float(jnp.max(jnp.abs(out_bf16 - ref)))
    )

    print("KERNEL_OK")
</pallas_src>

<mosaic_0001>
module attributes {stable_mosaic.version = 11 : i64} {
  func.func @_mlp_kernel(%arg0: i32, %arg1: memref<128x256xf32, #tpu.memory_space<vmem>>, %arg2: memref<4x128xf32, #tpu.memory_space<vmem>>, %arg3: memref<256x128xf32, #tpu.memory_space<vmem>>, %arg4: memref<128x128xf32, #tpu.memory_space<vmem>>, %arg5: memref<128x128xf32, #tpu.memory_space<vmem>>, %arg6: memref<128x128xf32, #tpu.memory_space<vmem>>, %arg7: memref<128x128xf32, #tpu.memory_space<vmem>>) attributes {dimension_semantics = [#tpu.dimension_semantics<parallel>], iteration_bounds = array<i64: 1>, scalar_prefetch = 0 : i64, scratch_operands = 0 : i64, tpu.core_type = #tpu.core_type<tc>, window_params = [{transform_indices = @transform_0, window_bounds = array<i64: 128, 256>}, {pipeline_mode = #tpu.pipeline_mode<synchronous>, transform_indices = @transform_1, window_bounds = array<i64: 4, 128>}, {pipeline_mode = #tpu.pipeline_mode<synchronous>, transform_indices = @transform_2, window_bounds = array<i64: 256, 128>}, {pipeline_mode = #tpu.pipeline_mode<synchronous>, transform_indices = @transform_3, window_bounds = array<i64: 128, 128>}, {pipeline_mode = #tpu.pipeline_mode<synchronous>, transform_indices = @transform_4, window_bounds = array<i64: 128, 128>}, {pipeline_mode = #tpu.pipeline_mode<synchronous>, transform_indices = @transform_5, window_bounds = array<i64: 128, 128>}, {transform_indices = @transform_6, window_bounds = array<i64: 128, 128>}]} {
    %c0 = arith.constant 0 : index
    %c0_0 = arith.constant 0 : index
    %0 = vector.load %arg2[%c0, %c0_0] : memref<4x128xf32, #tpu.memory_space<vmem>>, vector<4x128xf32>
    %c0_1 = arith.constant 0 : index
    %c0_2 = arith.constant 0 : index
    %1 = vector.load %arg1[%c0_1, %c0_2] : memref<128x256xf32, #tpu.memory_space<vmem>>, vector<128x256xf32>
    %c0_3 = arith.constant 0 : index
    %c0_4 = arith.constant 0 : index
    %2 = vector.load %arg3[%c0_3, %c0_4] : memref<256x128xf32, #tpu.memory_space<vmem>>, vector<256x128xf32>
    %cst = arith.constant dense<0.000000e+00> : vector<128x128xf32>
    %3 = tpu.matmul %1, %2, %cst {dimension_numbers = #tpu.dot_dimension_numbers<[1], [0], [0], [1], [0, 0, 1, 1], [], []>} : vector<128x256xf32>, vector<256x128xf32>, vector<128x128xf32> -> vector<128x128xf32>
    %4 = vector.extract_strided_slice %0 {offsets = [0, 0], sizes = [1, 128], strides = [1, 1]} : vector<4x128xf32> to vector<1x128xf32>
    %5 = vector.shape_cast %4 : vector<1x128xf32> to vector<128xf32>
    %6 = vector.shape_cast %5 : vector<128xf32> to vector<1x128xf32>
    %7 = vector.broadcast %6 : vector<1x128xf32> to vector<128x128xf32>
    %8 = arith.addf %3, %7 : vector<128x128xf32>
    %cst_5 = arith.constant 0.000000e+00 : f32
    %9 = vector.broadcast %cst_5 : f32 to vector<128x128xf32>
    %10 = arith.maximumf %8, %9 : vector<128x128xf32>
    %c0_6 = arith.constant 0 : index
    %c0_7 = arith.constant 0 : index
    %11 = vector.load %arg4[%c0_6, %c0_7] : memref<128x128xf32, #tpu.memory_space<vmem>>, vector<128x128xf32>
    %cst_8 = arith.constant dense<0.000000e+00> : vector<128x128xf32>
    %12 = tpu.matmul %10, %11, %cst_8 {dimension_numbers = #tpu.dot_dimension_numbers<[1], [0], [0], [1], [0, 0, 1, 1], [], []>} : vector<128x128xf32>, vector<128x128xf32>, vector<128x128xf32> -> vector<128x128xf32>
    %13 = vector.extract_strided_slice %0 {offsets = [1, 0], sizes = [1, 128], strides = [1, 1]} : vector<4x128xf32> to vector<1x128xf32>
    %14 = vector.shape_cast %13 : vector<1x128xf32> to vector<128xf32>
    %15 = vector.shape_cast %14 : vector<128xf32> to vector<1x128xf32>
    %16 = vector.broadcast %15 : vector<1x128xf32> to vector<128x128xf32>
    %17 = arith.addf %12, %16 : vector<128x128xf32>
    %cst_9 = arith.constant 0.000000e+00 : f32
    %18 = vector.broadcast %cst_9 : f32 to vector<128x128xf32>
    %19 = arith.maximumf %17, %18 : vector<128x128xf32>
    %c0_10 = arith.constant 0 : index
    %c0_11 = arith.constant 0 : index
    %20 = vector.load %arg5[%c0_10, %c0_11] : memref<128x128xf32, #tpu.memory_space<vmem>>, vector<128x128xf32>
    %cst_12 = arith.constant dense<0.000000e+00> : vector<128x128xf32>
    %21 = tpu.matmul %19, %20, %cst_12 {dimension_numbers = #tpu.dot_dimension_numbers<[1], [0], [0], [1], [0, 0, 1, 1], [], []>} : vector<128x128xf32>, vector<128x128xf32>, vector<128x128xf32> -> vector<128x128xf32>
    %22 = vector.extract_strided_slice %0 {offsets = [2, 0], sizes = [1, 128], strides = [1, 1]} : vector<4x128xf32> to vector<1x128xf32>
    %23 = vector.shape_cast %22 : vector<1x128xf32> to vector<128xf32>
    %24 = vector.shape_cast %23 : vector<128xf32> to vector<1x128xf32>
    %25 = vector.broadcast %24 : vector<1x128xf32> to vector<128x128xf32>
    %26 = arith.addf %21, %25 : vector<128x128xf32>
    %cst_13 = arith.constant 0.000000e+00 : f32
    %27 = vector.broadcast %cst_13 : f32 to vector<128x128xf32>
    %28 = arith.maximumf %26, %27 : vector<128x128xf32>
    %c0_14 = arith.constant 0 : index
    %c0_15 = arith.constant 0 : index
    %29 = vector.load %arg6[%c0_14, %c0_15] : memref<128x128xf32, #tpu.memory_space<vmem>>, vector<128x128xf32>
    %cst_16 = arith.constant dense<0.000000e+00> : vector<128x128xf32>
    %30 = tpu.matmul %28, %29, %cst_16 {dimension_numbers = #tpu.dot_dimension_numbers<[1], [0], [0], [1], [0, 0, 1, 1], [], []>} : vector<128x128xf32>, vector<128x128xf32>, vector<128x128xf32> -> vector<128x128xf32>
    %31 = vector.extract_strided_slice %0 {offsets = [3, 0], sizes = [1, 128], strides = [1, 1]} : vector<4x128xf32> to vector<1x128xf32>
    %32 = vector.shape_cast %31 : vector<1x128xf32> to vector<128xf32>
    %33 = vector.shape_cast %32 : vector<128xf32> to vector<1x128xf32>
    %34 = vector.broadcast %33 : vector<1x128xf32> to vector<128x128xf32>
    %35 = arith.addf %30, %34 : vector<128x128xf32>
    %c0_17 = arith.constant 0 : index
    %c0_18 = arith.constant 0 : index
    %36 = vector.load %arg7[%c0_17, %c0_18] : memref<128x128xf32, #tpu.memory_space<vmem>>, vector<128x128xf32>
    tpu.vector_store %arg7[%c0_17, %c0_18], %35 {strides = array<i32>} : memref<128x128xf32, #tpu.memory_space<vmem>>, vector<128x128xf32>,
    return
  }
  func.func @transform_0(%arg0: i32) -> (i32, i32) {
    %c0_i32 = arith.constant 0 : i32
    %c0_i32_0 = arith.constant 0 : i32
    return %arg0, %c0_i32 : i32, i32
  }
  func.func @transform_1(%arg0: i32) -> (i32, i32) {
    %c0_i32 = arith.constant 0 : i32
    %c0_i32_0 = arith.constant 0 : i32
    %c0_i32_1 = arith.constant 0 : i32
    return %c0_i32, %c0_i32_0 : i32, i32
  }
  func.func @transform_2(%arg0: i32) -> (i32, i32) {
    %c0_i32 = arith.constant 0 : i32
    %c0_i32_0 = arith.constant 0 : i32
    %c0_i32_1 = arith.constant 0 : i32
    return %c0_i32, %c0_i32_0 : i32, i32
  }
  func.func @transform_3(%arg0: i32) -> (i32, i32) {
    %c0_i32 = arith.constant 0 : i32
    %c0_i32_0 = arith.constant 0 : i32
    %c0_i32_1 = arith.constant 0 : i32
    return %c0_i32, %c0_i32_0 : i32, i32
  }
  func.func @transform_4(%arg0: i32) -> (i32, i32) {
    %c0_i32 = arith.constant 0 : i32
    %c0_i32_0 = arith.constant 0 : i32
    %c0_i32_1 = arith.constant 0 : i32
    return %c0_i32, %c0_i32_0 : i32, i32
  }
  func.func @transform_5(%arg0: i32) -> (i32, i32) {
    %c0_i32 = arith.constant 0 : i32
    %c0_i32_0 = arith.constant 0 : i32
    %c0_i32_1 = arith.constant 0 : i32
    return %c0_i32, %c0_i32_0 : i32, i32
  }
  func.func @transform_6(%arg0: i32) -> (i32, i32) {
    %c0_i32 = arith.constant 0 : i32
    %c0_i32_0 = arith.constant 0 : i32
    return %arg0, %c0_i32 : i32, i32
  }
}

</mosaic_0001>

<bundles_post_ra>
// kernel: tpu_custom_call.1
= control target key start
LH: loop header
LB: loop body
LE: loop exit
PB: predicated region body
PF: predicated region fallthrough
CT: control target
= control target key end

     0   :  { %11 = vsyncpa [#allocation3], 0  ;;  %s1005_s0 = inlined_call_operand.hbm [shape: f32[128,256], index: 0, kind: input, shape index: {}]   ;;  %s1006_s1 = inlined_call_operand.hbm [shape: f32[4,128], index: 1, kind: input, shape index: {}]   ;;  %s1007_s2 = inlined_call_operand.hbm [shape: f32[256,128], index: 2, kind: input, shape index: {}]   ;;  %s1008_s3 = inlined_call_operand.hbm [shape: f32[128,128], index: 3, kind: input, shape index: {}]   ;;  %s1009_s4 = inlined_call_operand.hbm [shape: f32[128,128], index: 4, kind: input, shape index: {}]   ;;  %s1010_s5 = inlined_call_operand.hbm [shape: f32[128,128], index: 5, kind: input, shape index: {}]   ;;  %s1011_s6 = inlined_call_operand.hbm [shape: f32[128,128], index: 6, kind: output, shape index: {}]  }
   0x1   :  { %12 = vsyncpa [#allocation6], 0 }
   0x2   :  { %13 = vsyncpa [#allocation9], 0 }
   0x3   :  { %14 = vsyncpa [#allocation12], 0  ;;  %s34_s23 = sshll.u32 %s1006_s1, 4  ;;  %s35_s23 = int_to_ptr.hbm [resolvable:$true] %s34_s23 }
   0x4   :  { %15 = vsyncpa [#allocation4], 0  ;;  %s881_s24 = smov [#allocation5]   ;;  %s57_s28 = sshll.u32 %s1008_s3, 4  ;;  %s58_s28 = int_to_ptr.hbm [resolvable:$true] %s57_s28 }
   0x5   :  { %s36_s25 = sshll.u32 %s881_s24, 4  ;;  %s882_s29 = smov [#allocation8]   ;;  %s37_s25 = int_to_ptr.vmem [resolvable:$true] %s36_s25 }
   0x6   :  { %39 = dma.hbm_to_vmem [thread:$0]  %s35_s23, 64, %s37_s25, [#allocation6]  }
   0x7   :  { %s59_s30 = sshll.u32 %s882_s29, 4  ;;  %s20_s9 = sshll.u32 %s1005_s0, 4  ;;  %s60_s30 = int_to_ptr.vmem [resolvable:$true] %s59_s30  ;;  %s21_s9 = int_to_ptr.hbm [resolvable:$true] %s20_s9 }
   0x8   :  { %s883_s1 = smov 128   ;;  %s884_s10 = smov 8  }
   0x9   :  { %65 = dma.hbm_to_vmem [thread:$0]  %s58_s28, 2048, %s60_s30, [#allocation9], %s883_s1, %s883_s1, %s884_s10  }
   0xa   :  { %s885_s11 = smov [#allocation2]   ;;  %s44_s14 = sshll.u32 %s1007_s2, 4  ;;  %s45_s14 = int_to_ptr.hbm [resolvable:$true] %s44_s14 }
   0xb   :  { %s22_s12 = sshll.u32 %s885_s11, 4  ;;  %s886_s15 = smov 256   ;;  %s23_s12 = int_to_ptr.vmem [resolvable:$true] %s22_s12 }
   0xc   :  { %s887_s16 = smov 16   ;;  %s888_s0 = smov [#allocation7]  }
   0xd   :  { %28 = dma.hbm_to_vmem [thread:$0]  %s21_s9, 4096, %s23_s12, [#allocation3], %s886_s15, %s886_s15, %s887_s16  }
   0xe   :  { %s46_s17 = sshll.u32 %s888_s0, 4  ;;  %s70_s20 = sshll.u32 %s1009_s4, 4  ;;  %s47_s17 = int_to_ptr.vmem [resolvable:$true] %s46_s17  ;;  %s71_s20 = int_to_ptr.hbm [resolvable:$true] %s70_s20 }
   0xf   :  { %52 = dma.hbm_to_vmem [thread:$0]  %s45_s14, 4096, %s47_s17, [#allocation6], %s883_s1, %s883_s1, %s884_s10  }
  0x10   :  { %s83_s2 = sshll.u32 %s1010_s5, 4  ;;  %s889_s23 = smov [#allocation10]   ;;  %s84_s2 = int_to_ptr.hbm [resolvable:$true] %s83_s2 }
  0x11   :  { %s72_s24 = sshll.u32 %s889_s23, 4  ;;  %s890_s25 = smov [#allocation11]   ;;  %s73_s24 = int_to_ptr.vmem [resolvable:$true] %s72_s24 }
  0x12   :  { %78 = dma.hbm_to_vmem [thread:$0]  %s71_s20, 2048, %s73_s24, [#allocation9], %s883_s1, %s883_s1, %s884_s10  }
  0x13   :  { %s85_s4 = sshll.u32 %s890_s25, 4  ;;  %s86_s4 = int_to_ptr.vmem [resolvable:$true] %s85_s4 }
  0x14   :  { %91 = dma.hbm_to_vmem [thread:$0]  %s84_s2, 2048, %s86_s4, [#allocation12], %s883_s1, %s883_s1, %s884_s10  }
  0x15   :  { %871 = dma.done.wait [#allocation3], 4096  }
  0x16   :  { %872 = vsyncadd [#allocation3], 4294963200 }
  0x17   :  { %873 = dma.done.wait [#allocation6], 4160  }
  0x18   :  { %874 = vsyncadd [#allocation6], 4294963136 }
  0x19   :  { %875 = dma.done.wait [#allocation9], 4096  }
  0x1a   :  { %876 = vsyncadd [#allocation9], 4294963200 }
  0x1b   :  { %877 = dma.done.wait [#allocation12], 2048  }
  0x1c   :  { %878 = vsyncadd [#allocation12], 4294965248  ;;  %v164_v0 = vld [vmem:[#allocation7 + $0x78] sm:$0xff]  ;;  %v163_v1 = vld [vmem:[#allocation7 + $0x70] sm:$0xff]  ;;  %s891_s5 = smov [#allocation13]   ;;  %s628_s29 = sshll.u32 %s1011_s6, 4  ;;  %s629_s29 = int_to_ptr.hbm [resolvable:$true] %s628_s29 }
  0x1d   :  { %644 = vmatpush.msra.mxu1 %v164_v0  ;;  %182 = vmatpush.msra.mxu0 %v164_v0  ;;  %v162_v2 = vld [vmem:[#allocation7 + $0x68] sm:$0xff]  ;;  %v161_v3 = vld [vmem:[#allocation7 + $0x60] sm:$0xff]  ;;  %v160_v4 = vld [vmem:[#allocation7 + $0x58] sm:$0xff]  ;;  %s626_s26 = sshll.u32 %s891_s5, 4  ;;  %s627_s26 = int_to_ptr.vmem [resolvable:$true] %s626_s26 }
  0x1e   :  { %645 = vmatpush.msra.mxu2 %v164_v0  ;;  %646 = vmatpush.msra.mxu3 %v164_v0  ;;  %v159_v5 = vld [vmem:[#allocation7 + $0x50] sm:$0xff]  ;;  %v158_v6 = vld [vmem:[#allocation7 + $0x48] sm:$0xff]  ;;  %v157_v7 = vld [vmem:[#allocation7 + $0x40] sm:$0xff] }
  0x1f   :  { %647 = vmatpush.msra.mxu1 %v163_v1  ;;  %183 = vmatpush.msra.mxu0 %v163_v1  ;;  %v156_v8 = vld [vmem:[#allocation7 + $0x38] sm:$0xff]  ;;  %v155_v9 = vld [vmem:[#allocation7 + $0x30] sm:$0xff]  ;;  %v154_v10 = vld [vmem:[#allocation7 + $0x28] sm:$0xff] }
  0x20   :  { %648 = vmatpush.msra.mxu2 %v163_v1  ;;  %649 = vmatpush.msra.mxu3 %v163_v1  ;;  %v153_v11 = vld [vmem:[#allocation7 + $0x20] sm:$0xff]  ;;  %v152_v12 = vld [vmem:[#allocation7 + $0x18] sm:$0xff]  ;;  %v151_v13 = vld [vmem:[#allocation7 + $0x10] sm:$0xff] }
  0x21   :  { %650 = vmatpush.msra.mxu1 %v162_v2  ;;  %184 = vmatpush.msra.mxu0 %v162_v2  ;;  %v150_v14 = vld [vmem:[#allocation7 + $0x8] sm:$0xff]  ;;  %v149_v15 = vld [vmem:[#allocation7] sm:$0xff]  ;;  %v180_v18 = vld [vmem:[#allocation7 + $0xf8] sm:$0xff] }
  0x22   :  { %651 = vmatpush.msra.mxu2 %v162_v2  ;;  %652 = vmatpush.msra.mxu3 %v162_v2  ;;  %v125_v16 = vld [vmem:[#allocation2 + $0x40] sm:$0xff]  ;;  %v179_v19 = vld [vmem:[#allocation7 + $0xf0] sm:$0xff]  ;;  %v178_v20 = vld [vmem:[#allocation7 + $0xe8] sm:$0xff] }
  0x23   :  { %653 = vmatpush.msra.mxu1 %v161_v3  ;;  %185 = vmatpush.msra.mxu0 %v161_v3  ;;  %v117_v17 = vld [vmem:[#allocation2] sm:$0xff]  ;;  %v127_v22 = vld [vmem:[#allocation2 + $0x50] sm:$0xff]  ;;  %v118_v40 = vld [vmem:[#allocation2 + $0x8] sm:$0xff] }
  0x24   :  { %654 = vmatpush.msra.mxu2 %v161_v3  ;;  %655 = vmatpush.msra.mxu3 %v161_v3  ;;  %v177_v21 = vld [vmem:[#allocation7 + $0xe0] sm:$0xff]  ;;  %v119_v23 = vld [vmem:[#allocation2 + $0x10] sm:$0xff]  ;;  %v176_v24 = vld [vmem:[#allocation7 + $0xd8] sm:$0xff] }
  0x25   :  { %656 = vmatpush.msra.mxu1 %v160_v4  ;;  %186 = vmatpush.msra.mxu0 %v160_v4  ;;  %v175_v25 = vld [vmem:[#allocation7 + $0xd0] sm:$0xff]  ;;  %v174_v26 = vld [vmem:[#allocation7 + $0xc8] sm:$0xff]  ;;  %v173_v27 = vld [vmem:[#allocation7 + $0xc0] sm:$0xff] }
  0x26   :  { %657 = vmatpush.msra.mxu2 %v160_v4  ;;  %658 = vmatpush.msra.mxu3 %v160_v4  ;;  %v129_v28 = vld [vmem:[#allocation2 + $0x60] sm:$0xff]  ;;  %v171_v31 = vld [vmem:[#allocation7 + $0xb0] sm:$0xff]  ;;  %v170_v32 = vld [vmem:[#allocation7 + $0xa8] sm:$0xff] }
  0x27   :  { %659 = vmatpush.msra.mxu1 %v159_v5  ;;  %187 = vmatpush.msra.mxu0 %v159_v5  ;;  %v121_v29 = vld [vmem:[#allocation2 + $0x20] sm:$0xff]  ;;  %v131_v34 = vld [vmem:[#allocation2 + $0x70] sm:$0xff]  ;;  %v120_v41 = vld [vmem:[#allocation2 + $0x18] sm:$0xff] }
  0x28   :  { %660 = vmatpush.msra.mxu2 %v159_v5  ;;  %661 = vmatpush.msra.mxu3 %v159_v5  ;;  %v172_v30 = vld [vmem:[#allocation7 + $0xb8] sm:$0xff]  ;;  %v169_v33 = vld [vmem:[#allocation7 + $0xa0] sm:$0xff]  ;;  %v123_v35 = vld [vmem:[#allocation2 + $0x30] sm:$0xff] }
  0x29   :  { %662 = vmatpush.msra.mxu1 %v158_v6  ;;  %188 = vmatpush.msra.mxu0 %v158_v6  ;;  %v168_v36 = vld [vmem:[#allocation7 + $0x98] sm:$0xff]  ;;  %v167_v37 = vld [vmem:[#allocation7 + $0x90] sm:$0xff]  ;;  %v166_v38 = vld [vmem:[#allocation7 + $0x88] sm:$0xff] }
  0x2a   :  { %663 = vmatpush.msra.mxu2 %v158_v6  ;;  %664 = vmatpush.msra.mxu3 %v158_v6  ;;  %v165_v39 = vld [vmem:[#allocation7 + $0x80] sm:$0xff]  ;;  %v124_v44 = vld [vmem:[#allocation2 + $0x38] sm:$0xff]  ;;  %v135_v45 = vld [vmem:[#allocation2 + $0x90] sm:$0xff] }
  0x2b   :  { %665 = vmatpush.msra.mxu1 %v157_v7  ;;  %189 = vmatpush.msra.mxu0 %v157_v7  ;;  %v122_v42 = vld [vmem:[#allocation2 + $0x28] sm:$0xff]  ;;  %v133_v43 = vld [vmem:[#allocation2 + $0x80] sm:$0xff]  ;;  %v128_v48 = vld [vmem:[#allocation2 + $0x58] sm:$0xff] }
  0x2c   :  { %666 = vmatpush.msra.mxu2 %v157_v7  ;;  %667 = vmatpush.msra.mxu3 %v157_v7  ;;  %v126_v46 = vld [vmem:[#allocation2 + $0x48] sm:$0xff]  ;;  %v137_v47 = vld [vmem:[#allocation2 + $0xa0] sm:$0xff]  ;;  %v139_v49 = vld [vmem:[#allocation2 + $0xb0] sm:$0xff] }
  0x2d   :  { %668 = vmatpush.msra.mxu1 %v156_v8  ;;  %190 = vmatpush.msra.mxu0 %v156_v8  ;;  %v130_v50 = vld [vmem:[#allocation2 + $0x68] sm:$0xff]  ;;  %v141_v51 = vld [vmem:[#allocation2 + $0xc0] sm:$0xff]  ;;  %v132_v52 = vld [vmem:[#allocation2 + $0x78] sm:$0xff] }
  0x2e   :  { %669 = vmatpush.msra.mxu2 %v156_v8  ;;  %670 = vmatpush.msra.mxu3 %v156_v8  ;;  %v134_v53 = vld [vmem:[#allocation2 + $0x88] sm:$0xff]  ;;  %v143_v54 = vld [vmem:[#allocation2 + $0xd0] sm:$0xff]  ;;  %v343_v55 = vld [vmem:[#allocation8 + $0x78] sm:$0xff] }
  0x2f   :  { %671 = vmatpush.msra.mxu1 %v155_v9  ;;  %191 = vmatpush.msra.mxu0 %v155_v9  ;;  %v342_v56 = vld [vmem:[#allocation8 + $0x70] sm:$0xff]  ;;  %v341_v58 = vld [vmem:[#allocation8 + $0x68] sm:$0xff]  ;;  %v145_v59 = vld [vmem:[#allocation2 + $0xe0] sm:$0xff] }
  0x30   :  { %672 = vmatpush.msra.mxu2 %v155_v9  ;;  %673 = vmatpush.msra.mxu3 %v155_v9  ;;  %v136_v57 = vld [vmem:[#allocation2 + $0x98] sm:$0xff]  ;;  %v340_v60 = vld [vmem:[#allocation8 + $0x60] sm:$0xff]  ;;  %v337_v0 = vld [vmem:[#allocation8 + $0x48] sm:$0xff] }
  0x31   :  { %674 = vmatpush.msra.mxu1 %v154_v10  ;;  %192 = vmatpush.msra.mxu0 %v154_v10  ;;  %v339_v61 = vld [vmem:[#allocation8 + $0x58] sm:$0xff]  ;;  %v338_v62 = vld [vmem:[#allocation8 + $0x50] sm:$0xff]  ;;  %v138_v63 = vld [vmem:[#allocation2 + $0xa8] sm:$0xff] }
  0x32   :  { %675 = vmatpush.msra.mxu2 %v154_v10  ;;  %676 = vmatpush.msra.mxu3 %v154_v10  ;;  %v147_v1 = vld [vmem:[#allocation2 + $0xf0] sm:$0xff]  ;;  %v336_v2 = vld [vmem:[#allocation8 + $0x40] sm:$0xff]  ;;  %v335_v3 = vld [vmem:[#allocation8 + $0x38] sm:$0xff] }
  0x33   :  { %677 = vmatpush.msra.mxu1 %v153_v11  ;;  %193 = vmatpush.msra.mxu0 %v153_v11  ;;  %v334_v4 = vld [vmem:[#allocation8 + $0x30] sm:$0xff]  ;;  %v333_v6 = vld [vmem:[#allocation8 + $0x28] sm:$0xff]  ;;  %v332_v7 = vld [vmem:[#allocation8 + $0x20] sm:$0xff] }
  0x34   :  { %678 = vmatpush.msra.mxu2 %v153_v11  ;;  %679 = vmatpush.msra.mxu3 %v153_v11  ;;  %v140_v5 = vld [vmem:[#allocation2 + $0xb8] sm:$0xff]  ;;  %v142_v11 = vld [vmem:[#allocation2 + $0xc8] sm:$0xff] }
  0x35   :  { %680 = vmatpush.msra.mxu1 %v152_v12  ;;  %194 = vmatpush.msra.mxu0 %v152_v12  ;;  %v331_v8 = vld [vmem:[#allocation8 + $0x18] sm:$0xff]  ;;  %v330_v9 = vld [vmem:[#allocation8 + $0x10] sm:$0xff] }
  0x36   :  { %681 = vmatpush.msra.mxu2 %v152_v12  ;;  %682 = vmatpush.msra.mxu3 %v152_v12  ;;  %v329_v12 = vld [vmem:[#allocation8 + $0x8] sm:$0xff] }
  0x37   :  { %683 = vmatpush.msra.mxu1 %v151_v13  ;;  %195 = vmatpush.msra.mxu0 %v151_v13 }
  0x38   :  { %684 = vmatpush.msra.mxu2 %v151_v13  ;;  %685 = vmatpush.msra.mxu3 %v151_v13  ;;  %v328_v13 = vld [vmem:[#allocation8] sm:$0xff] }
  0x39   :  { %686 = vmatpush.msra.mxu1 %v150_v14  ;;  %196 = vmatpush.msra.mxu0 %v150_v14 }
  0x3a   :  { %687 = vmatpush.msra.mxu2 %v150_v14  ;;  %688 = vmatpush.msra.mxu3 %v150_v14 }
  0x3b   :  { %689 = vmatpush.msra.mxu1 %v149_v15  ;;  %197 = vmatpush.msra.mxu0 %v149_v15 }
  0x3c   :  { %210 = vmatmul.f32.vlgmr.msra.gmra.mxu1 %v125_v16  ;;  %198 = vmatmul.f32.vlgmr.msra.gmra.mxu0 %v117_v17  ;;  %v146_v17 = vld [vmem:[#allocation2 + $0xe8] sm:$0xff] }
  0x3d   :  { %247 = vmatpush.msrb.mxu1 %v180_v18  ;;  %690 = vmatpush.msra.mxu2 %v149_v15 }
  0x3e   :  { %691 = vmatpush.msra.mxu3 %v149_v15  ;;  %222 = vmatmul.f32.vlgmr.msra.gmra.mxu2 %v133_v43  ;;  %v144_v15 = vld [vmem:[#allocation2 + $0xd8] sm:$0xff] }
  0x3f   :  { %248 = vmatpush.msrb.mxu1 %v179_v19  ;;  %234 = vmatmul.f32.vlgmr.msra.gmra.mxu3 %v141_v51  ;;  %v957_v19 = vld [vmem:[#allocation5] sm:$0xf] }
  0x40   :  { %345 = vmatpush.msrb.mxu2 %v343_v55 }
  0x41   :  { %249 = vmatpush.msrb.mxu1 %v178_v20 }
  0x42   :  { %346 = vmatpush.msrb.mxu2 %v342_v56 }
  0x43   :  { %250 = vmatpush.msrb.mxu1 %v177_v21  ;;  %v148_v21 = vld [vmem:[#allocation2 + $0xf8] sm:$0xff] }
  0x44   :  { %213 = vmatmul.f32.gmra.mxu1 %v127_v22  ;;  %201 = vmatmul.f32.gmra.mxu0 %v119_v23  ;;  %v960_v22 = vperm.slane %v957_v19, 0 }
  0x45   :  { %251 = vmatpush.msrb.mxu1 %v176_v24  ;;  %347 = vmatpush.msrb.mxu2 %v341_v58 }
  0x46   :  { %225 = vmatmul.f32.gmra.mxu2 %v135_v45 }
  0x47   :  { %252 = vmatpush.msrb.mxu1 %v175_v25  ;;  %237 = vmatmul.f32.gmra.mxu3 %v143_v54 }
  0x48   :  { %348 = vmatpush.msrb.mxu2 %v340_v60 }
  0x49   :  { %253 = vmatpush.msrb.mxu1 %v174_v26 }
  0x4a   :  { %349 = vmatpush.msrb.mxu2 %v339_v61 }
  0x4b   :  { %254 = vmatpush.msrb.mxu1 %v173_v27 }
  0x4c   :  { %216 = vmatmul.f32.gmra.mxu1 %v129_v28  ;;  %204 = vmatmul.f32.gmra.mxu0 %v121_v29 }
  0x4d   :  { %255 = vmatpush.msrb.mxu1 %v172_v30  ;;  %350 = vmatpush.msrb.mxu2 %v338_v62 }
  0x4e   :  { %228 = vmatmul.f32.gmra.mxu2 %v137_v47 }
  0x4f   :  { %256 = vmatpush.msrb.mxu1 %v171_v31  ;;  %240 = vmatmul.f32.gmra.mxu3 %v145_v59 }
  0x50   :  { %351 = vmatpush.msrb.mxu2 %v337_v0 }
  0x51   :  { %257 = vmatpush.msrb.mxu1 %v170_v32 }
  0x52   :  { %352 = vmatpush.msrb.mxu2 %v336_v2 }
  0x53   :  { %258 = vmatpush.msrb.mxu1 %v169_v33 }
  0x54   :  { %219 = vmatmul.f32.gmra.mxu1 %v131_v34  ;;  %207 = vmatmul.f32.gmra.mxu0 %v123_v35 }
  0x55   :  { %259 = vmatpush.msrb.mxu1 %v168_v36  ;;  %353 = vmatpush.msrb.mxu2 %v335_v3 }
  0x56   :  { %231 = vmatmul.f32.gmra.mxu2 %v139_v49 }
  0x57   :  { %260 = vmatpush.msrb.mxu1 %v167_v37  ;;  %243 = vmatmul.f32.gmra.mxu3 %v147_v1 }
  0x58   :  { %354 = vmatpush.msrb.mxu2 %v334_v4 }
  0x59   :  { %261 = vmatpush.msrb.mxu1 %v166_v38 }
  0x5a   :  { %355 = vmatpush.msrb.mxu2 %v333_v6  ;;  %v441_v6 = vld [vmem:[#allocation10 + $0x78] sm:$0xff] }
  0x5b   :  { %262 = vmatpush.msrb.mxu1 %v165_v39  ;;  %443 = vmatpush.msrb.mxu3 %v441_v6 }
  0x5c   :  { %263 = vmatmul.f32.vlgmr.msrb.gmra.mxu1 %v118_v40  ;;  %356 = vmatpush.msrb.mxu2 %v332_v7  ;;  %v440_v7 = vld [vmem:[#allocation10 + $0x70] sm:$0xff] }
  0x5d   :  { %444 = vmatpush.msrb.mxu3 %v440_v7 }
  0x5e   :  { %357 = vmatpush.msrb.mxu2 %v331_v8 }
  0x60   :  { %358 = vmatpush.msrb.mxu2 %v330_v9 }
  0x62   :  { %359 = vmatpush.msrb.mxu2 %v329_v12 }
  0x64   :  { %266 = vmatmul.f32.gmra.mxu1 %v120_v41  ;;  %360 = vmatpush.msrb.mxu2 %v328_v13  ;;  %v438_v13 = vld [vmem:[#allocation10 + $0x60] sm:$0xff] }
  0x6c   :  { %269 = vmatmul.f32.gmra.mxu1 %v122_v42 }
  0x74   :  { %272 = vmatmul.f32.gmra.mxu1 %v124_v44 }
  0x7c   :  { %275 = vmatmul.f32.gmra.mxu1 %v126_v46 }
  0x84   :  { %278 = vmatmul.f32.gmra.mxu1 %v128_v48 }
  0x8c   :  { %281 = vmatmul.f32.gmra.mxu1 %v130_v50 }
  0x94   :  { %284 = vmatmul.f32.gmra.mxu1 %v132_v52 }
  0x9c   :  { %287 = vmatmul.f32.gmra.mxu1 %v134_v53 }
  0xa4   :  { %290 = vmatmul.f32.gmra.mxu1 %v136_v57 }
  0xac   :  { %293 = vmatmul.f32.gmra.mxu1 %v138_v63 }
  0xb4   :  { %296 = vmatmul.f32.gmra.mxu1 %v140_v5 }
  0xb9   :  { %v211_v10 = vpop.f32.mrf.mxu1  ;;  %v199_v18 = vpop.f32.mrf.mxu0 }
  0xba   :  { %v200_v23 = vadd.f32 %v199_v18, %v960_v22  ;;  %v212_v42 = vadd.f32 %v211_v10, %v960_v22  ;;  %v439_v10 = vld [vmem:[#allocation10 + $0x68] sm:$0xff] }
  0xbb   :  { %445 = vmatpush.msrb.mxu3 %v439_v10 }
  0xbc   :  { %299 = vmatmul.f32.gmra.mxu1 %v142_v11 }
  0xbd   :  { %446 = vmatpush.msrb.mxu3 %v438_v13 }
  0xc1   :  { %v214_v14 = vpop.f32.mrf.mxu1  ;;  %v202_v24 = vpop.f32.mrf.mxu0 }
  0xc2   :  { %v203_v28 = vadd.f32 %v202_v24, %v960_v22  ;;  %v215_v46 = vadd.f32 %v214_v14, %v960_v22  ;;  %v223_v54 = vpop.f32.mrf.mxu2  ;;  %v235_v14 = vpop.f32.mrf.mxu3  ;;  %v434_v24 = vld [vmem:[#allocation10 + $0x40] sm:$0xff] }
  0xc3   :  { %v224_v59 = vadd.f32 %v223_v54, %v960_v22 }
  0xc4   :  { %302 = vmatmul.f32.gmra.mxu1 %v144_v15 }
  0xc9   :  { %v217_v16 = vpop.f32.mrf.mxu1  ;;  %v205_v30 = vpop.f32.mrf.mxu0 }
  0xca   :  { %v206_v33 = vadd.f32 %v205_v30, %v960_v22  ;;  %v218_v50 = vadd.f32 %v217_v16, %v960_v22  ;;  %v226_v60 = vpop.f32.mrf.mxu2  ;;  %v437_v16 = vld [vmem:[#allocation10 + $0x58] sm:$0xff] }
  0xcb   :  { %v227_v0 = vadd.f32 %v226_v60, %v960_v22  ;;  %447 = vmatpush.msrb.mxu3 %v437_v16 }
  0xcc   :  { %305 = vmatmul.f32.gmra.mxu1 %v146_v17  ;;  %v436_v17 = vld [vmem:[#allocation10 + $0x50] sm:$0xff] }
  0xcd   :  { %448 = vmatpush.msrb.mxu3 %v436_v17 }
  0xd1   :  { %v220_v20 = vpop.f32.mrf.mxu1  ;;  %v208_v36 = vpop.f32.mrf.mxu0 }
  0xd2   :  { %v209_v38 = vadd.f32 %v208_v36, %v960_v22  ;;  %v221_v55 = vadd.f32 %v220_v20, %v960_v22  ;;  %v229_v2 = vpop.f32.mrf.mxu2  ;;  %v428_v36 = vld [vmem:[#allocation10 + $0x10] sm:$0xff] }
  0xd3   :  { %v230_v5 = vadd.f32 %v229_v2, %v960_v22 }
  0xd4   :  { %308 = vmatmul.f32.gmra.mxu1 %v148_v21  ;;  %v435_v21 = vld [vmem:[#allocation10 + $0x48] sm:$0xff] }
  0xd5   :  { %449 = vmatpush.msrb.mxu3 %v435_v21 }
  0xd7   :  { %450 = vmatpush.msrb.mxu3 %v434_v24  ;;  %v537_v24 = vld [vmem:[#allocation11 + $0x68] sm:$0xff] }
  0xd9   :  { %v264_v25 = vpop.f32.mrf.mxu1 }
  0xda   :  { %v265_v26 = vadd.f32 %v264_v25, %v200_v23  ;;  %v232_v11 = vpop.f32.mrf.mxu2  ;;  %v236_v25 = vadd.f32 %v235_v14, %v960_v22 }
  0xdb   :  { %v233_v15 = vadd.f32 %v232_v11, %v960_v22 }
  0xdc   :  { %v312_v27 = vmax.f32 %v265_v26, 0.0  ;;  %v433_v26 = vld [vmem:[#allocation10 + $0x38] sm:$0xff] }
  0xdd   :  { %451 = vmatpush.msrb.mxu3 %v433_v26  ;;  %v536_v26 = vld [vmem:[#allocation11 + $0x60] sm:$0xff] }
  0xde   :  { %361 = vmatmul.f32.vlgmr.msrb.gmra.mxu2 %v312_v27  ;;  %v432_v27 = vld [vmem:[#allocation10 + $0x30] sm:$0xff] }
  0xdf   :  { %452 = vmatpush.msrb.mxu3 %v432_v27  ;;  %v535_v27 = vld [vmem:[#allocation11 + $0x58] sm:$0xff] }
  0xe1   :  { %v267_v29 = vpop.f32.mrf.mxu1 }
  0xe2   :  { %v268_v31 = vadd.f32 %v267_v29, %v203_v28  ;;  %v238_v28 = vpop.f32.mrf.mxu3  ;;  %v431_v29 = vld [vmem:[#allocation10 + $0x28] sm:$0xff] }
  0xe3   :  { %453 = vmatpush.msrb.mxu3 %v431_v29 }
  0xe4   :  { %v313_v32 = vmax.f32 %v268_v31, 0.0 }
  0xe6   :  { %364 = vmatmul.f32.gmra.mxu2 %v313_v32  ;;  %v430_v32 = vld [vmem:[#allocation10 + $0x20] sm:$0xff] }
  0xe7   :  { %454 = vmatpush.msrb.mxu3 %v430_v32 }
  0xe9   :  { %v270_v34 = vpop.f32.mrf.mxu1 }
  0xea   :  { %v271_v35 = vadd.f32 %v270_v34, %v206_v33  ;;  %v429_v34 = vld [vmem:[#allocation10 + $0x18] sm:$0xff] }
  0xeb   :  { %455 = vmatpush.msrb.mxu3 %v429_v34  ;;  %v531_v34 = vld [vmem:[#allocation11 + $0x38] sm:$0xff] }
  0xec   :  { %v314_v37 = vmax.f32 %v271_v35, 0.0  ;;  %v239_v35 = vadd.f32 %v238_v28, %v960_v22  ;;  %v534_v28 = vld [vmem:[#allocation11 + $0x50] sm:$0xff] }
  0xed   :  { %456 = vmatpush.msrb.mxu3 %v428_v36  ;;  %v529_v36 = vld [vmem:[#allocation11 + $0x28] sm:$0xff] }
  0xee   :  { %367 = vmatmul.f32.gmra.mxu2 %v314_v37 }
  0xf1   :  { %v273_v39 = vpop.f32.mrf.mxu1 }
  0xf2   :  { %v274_v40 = vadd.f32 %v273_v39, %v209_v38  ;;  %v241_v38 = vpop.f32.mrf.mxu3 }
  0xf4   :  { %v315_v41 = vmax.f32 %v274_v40, 0.0  ;;  %v427_v40 = vld [vmem:[#allocation10 + $0x8] sm:$0xff] }
  0xf5   :  { %457 = vmatpush.msrb.mxu3 %v427_v40 }
  0xf6   :  { %370 = vmatmul.f32.gmra.mxu2 %v315_v41 }
  0xf9   :  { %v276_v43 = vpop.f32.mrf.mxu1 }
  0xfa   :  { %v277_v44 = vadd.f32 %v276_v43, %v212_v42  ;;  %v426_v42 = vld [vmem:[#allocation10] sm:$0xff]  ;;  %v242_v43 = vadd.f32 %v241_v38, %v960_v22 }
  0xfb   :  { %458 = vmatpush.msrb.mxu3 %v426_v42  ;;  %v526_v42 = vld [vmem:[#allocation11 + $0x10] sm:$0xff] }
  0xfc   :  { %v316_v45 = vmax.f32 %v277_v44, 0.0 }
  0xfe   :  { %373 = vmatmul.f32.gmra.mxu2 %v316_v45 }
 0x101   :  { %v279_v47 = vpop.f32.mrf.mxu1 }
 0x102   :  { %v280_v48 = vadd.f32 %v279_v47, %v215_v46  ;;  %v244_v46 = vpop.f32.mrf.mxu3 }
 0x104   :  { %v317_v49 = vmax.f32 %v280_v48, 0.0  ;;  %v245_v48 = vadd.f32 %v244_v46, %v960_v22 }
 0x106   :  { %376 = vmatmul.f32.gmra.mxu2 %v317_v49 }
 0x109   :  { %v282_v51 = vpop.f32.mrf.mxu1 }
 0x10a   :  { %v283_v52 = vadd.f32 %v282_v51, %v218_v50 }
 0x10c   :  { %v318_v53 = vmax.f32 %v283_v52, 0.0  ;;  %v979_v52 = vperm.slane %v957_v19, 1 }
 0x10e   :  { %379 = vmatmul.f32.gmra.mxu2 %v318_v53 }
 0x111   :  { %v285_v56 = vpop.f32.mrf.mxu1 }
 0x112   :  { %v286_v57 = vadd.f32 %v285_v56, %v221_v55 }
 0x114   :  { %v319_v58 = vmax.f32 %v286_v57, 0.0 }
 0x116   :  { %382 = vmatmul.f32.gmra.mxu2 %v319_v58 }
 0x119   :  { %v288_v61 = vpop.f32.mrf.mxu1 }
 0x11a   :  { %v289_v62 = vadd.f32 %v288_v61, %v224_v59 }
 0x11c   :  { %v320_v63 = vmax.f32 %v289_v62, 0.0 }
 0x11e   :  { %385 = vmatmul.f32.gmra.mxu2 %v320_v63 }
 0x121   :  { %v291_v1 = vpop.f32.mrf.mxu1 }
 0x122   :  { %v292_v3 = vadd.f32 %v291_v1, %v227_v0 }
 0x124   :  { %v321_v4 = vmax.f32 %v292_v3, 0.0 }
 0x126   :  { %388 = vmatmul.f32.gmra.mxu2 %v321_v4 }
 0x129   :  { %v294_v8 = vpop.f32.mrf.mxu1 }
 0x12a   :  { %v295_v9 = vadd.f32 %v294_v8, %v230_v5 }
 0x12c   :  { %v322_v12 = vmax.f32 %v295_v9, 0.0 }
 0x12e   :  { %391 = vmatmul.f32.gmra.mxu2 %v322_v12 }
 0x131   :  { %v297_v18 = vpop.f32.mrf.mxu1 }
 0x132   :  { %v298_v20 = vadd.f32 %v297_v18, %v233_v15  ;;  %v539_v18 = vld [vmem:[#allocation11 + $0x78] sm:$0xff] }
 0x133   :  { %541 = vmatpush.msrb.mxu0 %v539_v18 }
 0x134   :  { %v323_v23 = vmax.f32 %v298_v20, 0.0  ;;  %v538_v20 = vld [vmem:[#allocation11 + $0x70] sm:$0xff] }
 0x135   :  { %542 = vmatpush.msrb.mxu0 %v538_v20 }
 0x136   :  { %394 = vmatmul.f32.gmra.mxu2 %v323_v23 }
 0x137   :  { %543 = vmatpush.msrb.mxu0 %v537_v24 }
 0x139   :  { %v300_v30 = vpop.f32.mrf.mxu1  ;;  %544 = vmatpush.msrb.mxu0 %v536_v26 }
 0x13a   :  { %v301_v31 = vadd.f32 %v300_v30, %v236_v25 }
 0x13b   :  { %545 = vmatpush.msrb.mxu0 %v535_v27 }
 0x13c   :  { %v324_v33 = vmax.f32 %v301_v31, 0.0  ;;  %v533_v31 = vld [vmem:[#allocation11 + $0x48] sm:$0xff] }
 0x13d   :  { %546 = vmatpush.msrb.mxu0 %v534_v28 }
 0x13e   :  { %397 = vmatmul.f32.gmra.mxu2 %v324_v33  ;;  %v532_v33 = vld [vmem:[#allocation11 + $0x40] sm:$0xff] }
 0x13f   :  { %547 = vmatpush.msrb.mxu0 %v533_v31 }
 0x141   :  { %v303_v37 = vpop.f32.mrf.mxu1  ;;  %548 = vmatpush.msrb.mxu0 %v532_v33 }
 0x142   :  { %v304_v39 = vadd.f32 %v303_v37, %v239_v35  ;;  %v530_v35 = vld [vmem:[#allocation11 + $0x30] sm:$0xff] }
 0x143   :  { %549 = vmatpush.msrb.mxu0 %v531_v34 }
 0x144   :  { %v325_v41 = vmax.f32 %v304_v39, 0.0  ;;  %v528_v39 = vld [vmem:[#allocation11 + $0x20] sm:$0xff] }
 0x145   :  { %550 = vmatpush.msrb.mxu0 %v530_v35 }
 0x146   :  { %400 = vmatmul.f32.gmra.mxu2 %v325_v41  ;;  %v527_v41 = vld [vmem:[#allocation11 + $0x18] sm:$0xff] }
 0x147   :  { %551 = vmatpush.msrb.mxu0 %v529_v36 }
 0x149   :  { %v306_v44 = vpop.f32.mrf.mxu1  ;;  %552 = vmatpush.msrb.mxu0 %v528_v39 }
 0x14a   :  { %v307_v45 = vadd.f32 %v306_v44, %v242_v43 }
 0x14b   :  { %553 = vmatpush.msrb.mxu0 %v527_v41 }
 0x14c   :  { %v326_v47 = vmax.f32 %v307_v45, 0.0  ;;  %v525_v45 = vld [vmem:[#allocation11 + $0x8] sm:$0xff] }
 0x14d   :  { %554 = vmatpush.msrb.mxu0 %v526_v42 }
 0x14e   :  { %403 = vmatmul.f32.gmra.mxu2 %v326_v47  ;;  %v524_v47 = vld [vmem:[#allocation11] sm:$0xff] }
 0x14f   :  { %555 = vmatpush.msrb.mxu0 %v525_v45 }
 0x151   :  { %v309_v49 = vpop.f32.mrf.mxu1  ;;  %556 = vmatpush.msrb.mxu0 %v524_v47 }
 0x152   :  { %v310_v50 = vadd.f32 %v309_v49, %v245_v48 }
 0x154   :  { %v327_v51 = vmax.f32 %v310_v50, 0.0 }
 0x156   :  { %406 = vmatmul.f32.gmra.mxu2 %v327_v51 }
 0x161   :  { %v362_v53 = vpop.f32.mrf.mxu2 }
 0x162   :  { %v363_v54 = vadd.f32 %v362_v53, %v979_v52 }
 0x164   :  { %v410_v55 = vmax.f32 %v363_v54, 0.0 }
 0x166   :  { %459 = vmatmul.f32.vlgmr.msrb.gmra.mxu3 %v410_v55  ;;  %v442_v55 = vperm.slane %v957_v19, 2 }
 0x169   :  { %v365_v56 = vpop.f32.mrf.mxu2 }
 0x16a   :  { %v366_v57 = vadd.f32 %v365_v56, %v979_v52 }
 0x16c   :  { %v411_v58 = vmax.f32 %v366_v57, 0.0 }
 0x16e   :  { %462 = vmatmul.f32.gmra.mxu3 %v411_v58 }
 0x171   :  { %v368_v59 = vpop.f32.mrf.mxu2 }
 0x172   :  { %v369_v22 = vadd.f32 %v368_v59, %v979_v52 }
 0x174   :  { %v412_v60 = vmax.f32 %v369_v22, 0.0 }
 0x176   :  { %465 = vmatmul.f32.gmra.mxu3 %v412_v60 }
 0x179   :  { %v371_v61 = vpop.f32.mrf.mxu2 }
 0x17a   :  { %v372_v62 = vadd.f32 %v371_v61, %v979_v52 }
 0x17c   :  { %v413_v63 = vmax.f32 %v372_v62, 0.0 }
 0x17e   :  { %468 = vmatmul.f32.gmra.mxu3 %v413_v63 }
 0x181   :  { %v374_v0 = vpop.f32.mrf.mxu2 }
 0x182   :  { %v375_v1 = vadd.f32 %v374_v0, %v979_v52 }
 0x184   :  { %v414_v2 = vmax.f32 %v375_v1, 0.0 }
 0x186   :  { %471 = vmatmul.f32.gmra.mxu3 %v414_v2 }
 0x189   :  { %v377_v3 = vpop.f32.mrf.mxu2 }
 0x18a   :  { %v378_v4 = vadd.f32 %v377_v3, %v979_v52 }
 0x18c   :  { %v415_v5 = vmax.f32 %v378_v4, 0.0 }
 0x18e   :  { %474 = vmatmul.f32.gmra.mxu3 %v415_v5 }
 0x191   :  { %v380_v6 = vpop.f32.mrf.mxu2 }
 0x192   :  { %v381_v7 = vadd.f32 %v380_v6, %v979_v52 }
 0x194   :  { %v416_v8 = vmax.f32 %v381_v7, 0.0 }
 0x196   :  { %477 = vmatmul.f32.gmra.mxu3 %v416_v8 }
 0x199   :  { %v383_v9 = vpop.f32.mrf.mxu2 }
 0x19a   :  { %v384_v10 = vadd.f32 %v383_v9, %v979_v52 }
 0x19c   :  { %v417_v11 = vmax.f32 %v384_v10, 0.0 }
 0x19e   :  { %480 = vmatmul.f32.gmra.mxu3 %v417_v11 }
 0x1a1   :  { %v386_v12 = vpop.f32.mrf.mxu2 }
 0x1a2   :  { %v387_v13 = vadd.f32 %v386_v12, %v979_v52 }
 0x1a4   :  { %v418_v14 = vmax.f32 %v387_v13, 0.0 }
 0x1a6   :  { %483 = vmatmul.f32.gmra.mxu3 %v418_v14 }
 0x1a9   :  { %v389_v15 = vpop.f32.mrf.mxu2 }
 0x1aa   :  { %v390_v16 = vadd.f32 %v389_v15, %v979_v52 }
 0x1ac   :  { %v419_v17 = vmax.f32 %v390_v16, 0.0 }
 0x1ae   :  { %486 = vmatmul.f32.gmra.mxu3 %v419_v17 }
 0x1b1   :  { %v392_v21 = vpop.f32.mrf.mxu2 }
 0x1b2   :  { %v393_v23 = vadd.f32 %v392_v21, %v979_v52 }
 0x1b4   :  { %v420_v25 = vmax.f32 %v393_v23, 0.0 }
 0x1b6   :  { %489 = vmatmul.f32.gmra.mxu3 %v420_v25 }
 0x1b9   :  { %v395_v29 = vpop.f32.mrf.mxu2 }
 0x1ba   :  { %v396_v30 = vadd.f32 %v395_v29, %v979_v52 }
 0x1bc   :  { %v421_v32 = vmax.f32 %v396_v30, 0.0 }
 0x1be   :  { %492 = vmatmul.f32.gmra.mxu3 %v421_v32 }
 0x1c1   :  { %v398_v37 = vpop.f32.mrf.mxu2 }
 0x1c2   :  { %v399_v38 = vadd.f32 %v398_v37, %v979_v52 }
 0x1c4   :  { %v422_v40 = vmax.f32 %v399_v38, 0.0 }
 0x1c6   :  { %495 = vmatmul.f32.gmra.mxu3 %v422_v40  ;;  %v540_v40 = vperm.slane %v957_v19, 3 }
 0x1c9   :  { %v401_v43 = vpop.f32.mrf.mxu2 }
 0x1ca   :  { %v402_v44 = vadd.f32 %v401_v43, %v979_v52 }
 0x1cc   :  { %v423_v46 = vmax.f32 %v402_v44, 0.0 }
 0x1ce   :  { %498 = vmatmul.f32.gmra.mxu3 %v423_v46 }
 0x1d1   :  { %v404_v48 = vpop.f32.mrf.mxu2 }
 0x1d2   :  { %v405_v49 = vadd.f32 %v404_v48, %v979_v52 }
 0x1d4   :  { %v424_v50 = vmax.f32 %v405_v49, 0.0 }
 0x1d6   :  { %501 = vmatmul.f32.gmra.mxu3 %v424_v50 }
 0x1d9   :  { %v407_v51 = vpop.f32.mrf.mxu2 }
 0x1da   :  { %v408_v53 = vadd.f32 %v407_v51, %v979_v52 }
 0x1dc   :  { %v425_v54 = vmax.f32 %v408_v53, 0.0 }
 0x1de   :  { %504 = vmatmul.f32.gmra.mxu3 %v425_v54 }
 0x1e9   :  { %v460_v56 = vpop.f32.mrf.mxu3 }
 0x1ea   :  { %v461_v57 = vadd.f32 %v460_v56, %v442_v55 }
 0x1ec   :  { %v508_v58 = vmax.f32 %v461_v57, 0.0 }
 0x1ee   :  { %557 = vmatmul.f32.vlgmr.msrb.gmra.mxu0 %v508_v58 }
 0x1f1   :  { %v463_v59 = vpop.f32.mrf.mxu3 }
 0x1f2   :  { %v464_v22 = vadd.f32 %v463_v59, %v442_v55 }
 0x1f4   :  { %v509_v60 = vmax.f32 %v464_v22, 0.0 }
 0x1f6   :  { %560 = vmatmul.f32.gmra.mxu0 %v509_v60 }
 0x1f9   :  { %v466_v61 = vpop.f32.mrf.mxu3 }
 0x1fa   :  { %v467_v62 = vadd.f32 %v466_v61, %v442_v55 }
 0x1fc   :  { %v510_v63 = vmax.f32 %v467_v62, 0.0 }
 0x1fe   :  { %563 = vmatmul.f32.gmra.mxu0 %v510_v63 }
 0x201   :  { %v469_v0 = vpop.f32.mrf.mxu3 }
 0x202   :  { %v470_v1 = vadd.f32 %v469_v0, %v442_v55 }
 0x204   :  { %v511_v2 = vmax.f32 %v470_v1, 0.0 }
 0x206   :  { %566 = vmatmul.f32.gmra.mxu0 %v511_v2 }
 0x209   :  { %v472_v52 = vpop.f32.mrf.mxu3 }
 0x20a   :  { %v473_v3 = vadd.f32 %v472_v52, %v442_v55 }
 0x20c   :  { %v512_v4 = vmax.f32 %v473_v3, 0.0 }
 0x20e   :  { %569 = vmatmul.f32.gmra.mxu0 %v512_v4 }
 0x211   :  { %v475_v5 = vpop.f32.mrf.mxu3 }
 0x212   :  { %v476_v6 = vadd.f32 %v475_v5, %v442_v55 }
 0x214   :  { %v513_v7 = vmax.f32 %v476_v6, 0.0 }
 0x216   :  { %572 = vmatmul.f32.gmra.mxu0 %v513_v7 }
 0x219   :  { %v478_v8 = vpop.f32.mrf.mxu3 }
 0x21a   :  { %v479_v9 = vadd.f32 %v478_v8, %v442_v55 }
 0x21c   :  { %v514_v10 = vmax.f32 %v479_v9, 0.0 }
 0x21e   :  { %575 = vmatmul.f32.gmra.mxu0 %v514_v10 }
 0x221   :  { %v481_v11 = vpop.f32.mrf.mxu3 }
 0x222   :  { %v482_v12 = vadd.f32 %v481_v11, %v442_v55 }
 0x224   :  { %v515_v13 = vmax.f32 %v482_v12, 0.0 }
 0x226   :  { %578 = vmatmul.f32.gmra.mxu0 %v515_v13 }
 0x229   :  { %v484_v14 = vpop.f32.mrf.mxu3 }
 0x22a   :  { %v485_v15 = vadd.f32 %v484_v14, %v442_v55 }
 0x22c   :  { %v516_v16 = vmax.f32 %v485_v15, 0.0 }
 0x22e   :  { %581 = vmatmul.f32.gmra.mxu0 %v516_v16 }
 0x231   :  { %v487_v17 = vpop.f32.mrf.mxu3 }
 0x232   :  { %v488_v18 = vadd.f32 %v487_v17, %v442_v55 }
 0x234   :  { %v517_v20 = vmax.f32 %v488_v18, 0.0 }
 0x236   :  { %584 = vmatmul.f32.gmra.mxu0 %v517_v20 }
 0x239   :  { %v490_v21 = vpop.f32.mrf.mxu3 }
 0x23a   :  { %v491_v23 = vadd.f32 %v490_v21, %v442_v55 }
 0x23c   :  { %v518_v24 = vmax.f32 %v491_v23, 0.0 }
 0x23e   :  { %587 = vmatmul.f32.gmra.mxu0 %v518_v24 }
 0x241   :  { %v493_v25 = vpop.f32.mrf.mxu3 }
 0x242   :  { %v494_v26 = vadd.f32 %v493_v25, %v442_v55 }
 0x244   :  { %v519_v27 = vmax.f32 %v494_v26, 0.0 }
 0x246   :  { %590 = vmatmul.f32.gmra.mxu0 %v519_v27 }
 0x249   :  { %v496_v28 = vpop.f32.mrf.mxu3 }
 0x24a   :  { %v497_v29 = vadd.f32 %v496_v28, %v442_v55 }
 0x24c   :  { %v520_v30 = vmax.f32 %v497_v29, 0.0 }
 0x24e   :  { %593 = vmatmul.f32.gmra.mxu0 %v520_v30 }
 0x251   :  { %v499_v31 = vpop.f32.mrf.mxu3 }
 0x252   :  { %v500_v32 = vadd.f32 %v499_v31, %v442_v55 }
 0x254   :  { %v521_v33 = vmax.f32 %v500_v32, 0.0 }
 0x256   :  { %596 = vmatmul.f32.gmra.mxu0 %v521_v33 }
 0x259   :  { %v502_v34 = vpop.f32.mrf.mxu3 }
 0x25a   :  { %v503_v35 = vadd.f32 %v502_v34, %v442_v55 }
 0x25c   :  { %v522_v36 = vmax.f32 %v503_v35, 0.0 }
 0x25e   :  { %599 = vmatmul.f32.gmra.mxu0 %v522_v36 }
 0x261   :  { %v505_v37 = vpop.f32.mrf.mxu3 }
 0x262   :  { %v506_v38 = vadd.f32 %v505_v37, %v442_v55 }
 0x264   :  { %v523_v39 = vmax.f32 %v506_v38, 0.0 }
 0x266   :  { %602 = vmatmul.f32.gmra.mxu0 %v523_v39 }
 0x26b   :  { %v558_v41 = vpop.f32.mrf.mxu0 }
 0x26c   :  { %v559_v42 = vadd.f32 %v558_v41, %v540_v40 }
 0x26e   :  { %606 = vst [vmem:[#allocation13] sm:$0xff] %v559_v42 }
 0x273   :  { %v561_v43 = vpop.f32.mrf.mxu0 }
 0x274   :  { %v562_v44 = vadd.f32 %v561_v43, %v540_v40 }
 0x276   :  { %607 = vst [vmem:[#allocation13 + $0x8] sm:$0xff] %v562_v44 }
 0x27b   :  { %v564_v45 = vpop.f32.mrf.mxu0 }
 0x27c   :  { %v565_v46 = vadd.f32 %v564_v45, %v540_v40 }
 0x27e   :  { %608 = vst [vmem:[#allocation13 + $0x10] sm:$0xff] %v565_v46 }
 0x283   :  { %v567_v47 = vpop.f32.mrf.mxu0 }
 0x284   :  { %v568_v48 = vadd.f32 %v567_v47, %v540_v40 }
 0x286   :  { %609 = vst [vmem:[#allocation13 + $0x18] sm:$0xff] %v568_v48 }
 0x28b   :  { %v570_v49 = vpop.f32.mrf.mxu0 }
 0x28c   :  { %v571_v50 = vadd.f32 %v570_v49, %v540_v40 }
 0x28e   :  { %610 = vst [vmem:[#allocation13 + $0x20] sm:$0xff] %v571_v50 }
 0x293   :  { %v573_v51 = vpop.f32.mrf.mxu0 }
 0x294   :  { %v574_v53 = vadd.f32 %v573_v51, %v540_v40 }
 0x296   :  { %611 = vst [vmem:[#allocation13 + $0x28] sm:$0xff] %v574_v53 }
 0x29b   :  { %v576_v54 = vpop.f32.mrf.mxu0 }
 0x29c   :  { %v577_v19 = vadd.f32 %v576_v54, %v540_v40 }
 0x29e   :  { %612 = vst [vmem:[#allocation13 + $0x30] sm:$0xff] %v577_v19 }
 0x2a3   :  { %v579_v55 = vpop.f32.mrf.mxu0 }
 0x2a4   :  { %v580_v56 = vadd.f32 %v579_v55, %v540_v40 }
 0x2a6   :  { %613 = vst [vmem:[#allocation13 + $0x38] sm:$0xff] %v580_v56 }
 0x2ab   :  { %v582_v57 = vpop.f32.mrf.mxu0 }
 0x2ac   :  { %v583_v58 = vadd.f32 %v582_v57, %v540_v40 }
 0x2ae   :  { %614 = vst [vmem:[#allocation13 + $0x40] sm:$0xff] %v583_v58 }
 0x2b3   :  { %v585_v59 = vpop.f32.mrf.mxu0 }
 0x2b4   :  { %v586_v22 = vadd.f32 %v585_v59, %v540_v40 }
 0x2b6   :  { %615 = vst [vmem:[#allocation13 + $0x48] sm:$0xff] %v586_v22 }
 0x2bb   :  { %v588_v60 = vpop.f32.mrf.mxu0 }
 0x2bc   :  { %v589_v61 = vadd.f32 %v588_v60, %v540_v40 }
 0x2be   :  { %616 = vst [vmem:[#allocation13 + $0x50] sm:$0xff] %v589_v61 }
 0x2c3   :  { %v591_v62 = vpop.f32.mrf.mxu0 }
 0x2c4   :  { %v592_v63 = vadd.f32 %v591_v62, %v540_v40 }
 0x2c6   :  { %617 = vst [vmem:[#allocation13 + $0x58] sm:$0xff] %v592_v63 }
 0x2cb   :  { %v594_v0 = vpop.f32.mrf.mxu0 }
 0x2cc   :  { %v595_v1 = vadd.f32 %v594_v0, %v540_v40 }
 0x2ce   :  { %618 = vst [vmem:[#allocation13 + $0x60] sm:$0xff] %v595_v1 }
 0x2d3   :  { %v597_v2 = vpop.f32.mrf.mxu0 }
 0x2d4   :  { %v598_v52 = vadd.f32 %v597_v2, %v540_v40 }
 0x2d6   :  { %619 = vst [vmem:[#allocation13 + $0x68] sm:$0xff] %v598_v52 }
 0x2db   :  { %v600_v3 = vpop.f32.mrf.mxu0 }
 0x2dc   :  { %v601_v4 = vadd.f32 %v600_v3, %v540_v40 }
 0x2de   :  { %620 = vst [vmem:[#allocation13 + $0x70] sm:$0xff] %v601_v4 }
 0x2e3   :  { %v603_v5 = vpop.f32.mrf.mxu0 }
 0x2e4   :  { %v604_v6 = vadd.f32 %v603_v5, %v540_v40 }
 0x2e6   :  { %621 = vst [vmem:[#allocation13 + $0x78] sm:$0xff] %v604_v6 }
 0x2e7   :  { %634 = dma.vmem_to_hbm [thread:$0]  %s627_s26, 2048, %s629_s29, [#allocation4], %s883_s1, %s883_s1, %s884_s10  }
 0x2e8   :  { %879 = dma.done.wait [#allocation4], 2048  }
 0x2e9   :  { %880 = vsyncadd [#allocation4], 4294965248 }
 0x2ea   :  { %639 = vsyncpa [#allocation3], 1 }
 0x2eb   :  { %640 = vsyncpa [#allocation6], 1 }
 0x2ec   :  { %641 = vsyncpa [#allocation9], 1 }
 0x2ed   :  { %642 = vsyncpa [#allocation12], 1 }
 0x2ee   :  { %643 = vsyncpa [#allocation4], 1 }

</bundles_post_ra>
